<compile_context>
chip_gen: v7x
topology: tpu7x:2x2x1
jax: 0.10.0
libtpu: 0.0.40
codegen_flags: <defaults>
</compile_context>

<pallas_src>
import math
import functools

import jax
import jax.numpy as jnp
from jax import lax
from jax.experimental import pallas as pl
from jax.experimental.pallas import tpu as pltpu


# ----------------------------------------------------------------------------
# Generic row-tiled linear kernel: y = x @ W + b  (bf16 MXU operands, f32 acc)
# ----------------------------------------------------------------------------
def _linear_kernel(x_ref, w_ref, b_ref, o_ref):
    x = x_ref[...].astype(jnp.bfloat16)                 # (tm, K) MXU operand
    w = w_ref[...]                                      # (K, N) bf16, grid-invariant
    acc = jnp.dot(x, w, preferred_element_type=jnp.float32)
    acc = acc + b_ref[...].astype(jnp.float32)          # (1, N) broadcast
    o_ref[...] = acc.astype(o_ref.dtype)


def _row_tile(m, preferred=256):
    if m <= preferred:
        return m
    for t in range(preferred, 7, -8):
        if m % t == 0:
            return t
    return m


def pallas_linear(x2d, w, b, out_dtype):
    """x2d: (M, K); w: (K, N) (input-major, y = x @ W + b); b: (N,)."""
    M, K = x2d.shape
    N = w.shape[1]
    tm = _row_tile(M)
    assert M % tm == 0

    w_bf16 = w.astype(jnp.bfloat16)
    b2d = b.reshape(1, N).astype(jnp.float32)

    # VMEM budget: double-buffered x/out tiles + (single logical) weight + bias.
    est = 2 * (tm * K * 4 + tm * N * 4) + 2 * (K * N * 2) + 2 * (N * 4)
    vmem_limit = int(min(max(2 * est, 8 << 20), 64 << 20))

    return pl.pallas_call(
        _linear_kernel,
        out_shape=jax.ShapeDtypeStruct((M, N), out_dtype),
        grid_spec=pltpu.PrefetchScalarGridSpec(
            num_scalar_prefetch=0,
            grid=(M // tm,),
            in_specs=[
                pl.BlockSpec((tm, K), lambda i: (i, 0)),
                pl.BlockSpec((K, N), lambda i: (0, 0)),   # grid-invariant weight
                pl.BlockSpec((1, N), lambda i: (0, 0)),
            ],
            out_specs=pl.BlockSpec((tm, N), lambda i: (i, 0)),
        ),
        compiler_params=pltpu.CompilerParams(
            dimension_semantics=("parallel",),
            vmem_limit_bytes=vmem_limit,
        ),
    )(x2d, w_bf16, b2d)


# ----------------------------------------------------------------------------
# Flash attention kernel.
# Grid: (B, H, n_steps) where n_steps enumerates only lower-triangular (qi, ki)
# tile pairs via two scalar-prefetched SMEM maps.  Online softmax over ki.
# ----------------------------------------------------------------------------
def _flash_kernel(qi_map_ref, ki_map_ref, q_ref, k_ref, v_ref, o_ref,
                  m_sc, l_sc, acc_sc, *, t_q, t_k):
    step = pl.program_id(2)
    qi = qi_map_ref[step]        # SMEM scalar reads
    ki = ki_map_ref[step]

    @pl.when(ki == 0)
    def _init():
        m_sc[...] = jnp.full((t_q, 1), -jnp.inf, dtype=jnp.float32)
        l_sc[...] = jnp.zeros((t_q, 1), dtype=jnp.float32)
        acc_sc[...] = jnp.zeros(acc_sc.shape, dtype=jnp.float32)

    def accumulate(apply_mask):
        q = q_ref[0, 0]                                   # (t_q, D) bf16 (pre-scaled)
        k = k_ref[0, 0]                                   # (t_k, D) bf16
        v = v_ref[0, 0]                                   # (t_k, D) bf16
        # q @ k^T without materializing the transpose: contract the D axes.
        logits = lax.dot_general(q, k, (((1,), (1,)), ((), ())),
                                 preferred_element_type=jnp.float32)   # (t_q, t_k)
        if apply_mask:                                    # only on diagonal tiles
            q_pos = qi * t_q + lax.broadcasted_iota(jnp.int32, (t_q, t_k), 0)
            k_pos = ki * t_k + lax.broadcasted_iota(jnp.int32, (t_q, t_k), 1)
            logits = jnp.where(q_pos >= k_pos, logits, -jnp.inf)
        m_prev = m_sc[...]
        m_new = jnp.maximum(m_prev, jnp.max(logits, axis=-1, keepdims=True))
        alpha = jnp.exp(m_prev - m_new)
        p = jnp.exp(logits - m_new)
        l_sc[...] = alpha * l_sc[...] + jnp.sum(p, axis=-1, keepdims=True)
        acc_sc[...] = alpha * acc_sc[...] + jnp.dot(
            p.astype(v.dtype), v, preferred_element_type=jnp.float32)
        m_sc[...] = m_new

    # Only lower-triangular tiles are ever visited:
    #   ki < qi  -> fully visible, no mask.
    #   ki == qi -> diagonal tile (needs mask) and is the last step for this qi,
    #               so finalize there.
    @pl.when(ki < qi)
    def _interior_tile():
        accumulate(apply_mask=False)

    @pl.when(ki == qi)
    def _diag_tile_and_finalize():
        accumulate(apply_mask=True)
        inv_l = pl.reciprocal(l_sc[...], approx=True)     # EUP; delayed normalization
        o_ref[0, 0] = (acc_sc[...] * inv_l).astype(o_ref.dtype)


def _seq_tile(T, max_tile=128):
    if T <= max_tile:
        return T
    for t in range(max_tile, 7, -8):
        if T % t == 0:
            return t
    raise ValueError(f"sequence length {T} has no tile (multiple of 8, <= {max_tile})")


def flash_attention(q, k, v, out_dtype=jnp.bfloat16, max_tile=128):
    """q, k, v: (B, H, T, D). Causal attention; scale assumed folded into q."""
    B, H, T, D = q.shape
    t_q = t_k = _seq_tile(T, max_tile)
    nq = T // t_q

    # Lower-triangular tile enumeration (qi ascending, ki = 0..qi).  Only these
    # tile pairs are ever executed or DMA'd.
    qi_list, ki_list = [], []
    for qi in range(nq):
        for ki in range(qi + 1):
            qi_list.append(qi)
            ki_list.append(ki)
    n_steps = len(qi_list)
    qi_map = jnp.asarray(qi_list, dtype=jnp.int32)
    ki_map = jnp.asarray(ki_list, dtype=jnp.int32)

    kernel = functools.partial(_flash_kernel, t_q=t_q, t_k=t_k)

    # index_maps receive the scalar-prefetch refs as trailing positional args.
    q_spec = pl.BlockSpec((1, 1, t_q, D), lambda b, h, s, qm, km: (b, h, qm[s], 0))
    kv_spec = pl.BlockSpec((1, 1, t_k, D), lambda b, h, s, qm, km: (b, h, km[s], 0))
    o_spec = pl.BlockSpec((1, 1, t_q, D), lambda b, h, s, qm, km: (b, h, qm[s], 0))

    est = (2 * (t_q * D * 2 + 2 * t_k * D * 2 + t_q * D * 2)   # q/k/v/out double-buffered
           + 2 * t_q * 128 * 4 + t_q * D * 4)                  # m/l (lane-padded) + acc
    vmem_limit = int(min(max(4 * est, 8 << 20), 64 << 20))

    return pl.pallas_call(
        kernel,
        out_shape=jax.ShapeDtypeStruct((B, H, T, D), out_dtype),
        grid_spec=pltpu.PrefetchScalarGridSpec(
            num_scalar_prefetch=2,
            grid=(B, H, n_steps),
            in_specs=[q_spec, kv_spec, kv_spec],
            out_specs=o_spec,
            scratch_shapes=[
                pltpu.VMEM((t_q, 1), jnp.float32),   # running max m
                pltpu.VMEM((t_q, 1), jnp.float32),   # running sum l
                pltpu.VMEM((t_q, D), jnp.float32),   # un-normalized accumulator
            ],
        ),
        compiler_params=pltpu.CompilerParams(
            dimension_semantics=("parallel", "parallel", "arbitrary"),
            vmem_limit_bytes=vmem_limit,
        ),
    )(qi_map, ki_map, q, k, v)


# ----------------------------------------------------------------------------
# Full SelfAttention forward (eval mode)
# ----------------------------------------------------------------------------
def self_attention(x, params, n_head):
    """x: (B, T, C) float32. params: wq/wk/wv/wp (C,C) input-major, bq/bk/bv/bp (C,)."""
    B, T, C = x.shape
    assert C % n_head == 0
    D = C // n_head
    scale = 1.0 / math.sqrt(D)

    # Fused QKV weight; 1/sqrt(D) folded into the query projection so the
    # attention kernel never multiplies (T,T) logits by the scale.
    w_qkv = jnp.concatenate([params["wq"] * scale, params["wk"], params["wv"]], axis=1)
    b_qkv = jnp.concatenate([params["bq"] * scale, params["bk"], params["bv"]])

    qkv = pallas_linear(x.reshape(B * T, C), w_qkv, b_qkv,
                        out_dtype=jnp.bfloat16)                      # (B*T, 3C)
    qkv = qkv.reshape(B, T, 3, n_head, D).transpose(2, 0, 3, 1, 4)   # (3, B, H, T, D)
    q, k, v = qkv[0], qkv[1], qkv[2]

    y = flash_attention(q, k, v, out_dtype=jnp.bfloat16)             # (B, H, T, D)
    y = y.transpose(0, 2, 1, 3).reshape(B * T, C)                    # (B*T, C)

    out = pallas_linear(y, params["wp"], params["bp"], out_dtype=x.dtype)
    return out.reshape(B, T, C)


def reference_self_attention(x, params, n_head):
    """Pure-JAX f32 reference mirroring the PyTorch forward (eval mode)."""
    B, T, C = x.shape
    D = C // n_head
    q = x @ params["wq"] + params["bq"]
    k = x @ params["wk"] + params["bk"]
    v = x @ params["wv"] + params["bv"]
    q = q.reshape(B, T, n_head, D).transpose(0, 2, 1, 3)
    k = k.reshape(B, T, n_head, D).transpose(0, 2, 1, 3)
    v = v.reshape(B, T, n_head, D).transpose(0, 2, 1, 3)
    att = jnp.einsum("bhtd,bhsd->bhts", q, k) * (1.0 / math.sqrt(D))
    mask = jnp.tril(jnp.ones((T, T), dtype=bool))
    att = jnp.where(mask[None, None], att, -jnp.inf)
    att = jax.nn.softmax(att, axis=-1)
    y = jnp.einsum("bhts,bhsd->bhtd", att, v)
    y = y.transpose(0, 2, 1, 3).reshape(B, T, C)
    return y @ params["wp"] + params["bp"]


def init_params(key, n_embd):
    """Deterministic parameter init (PyTorch Linear-style uniform bound)."""
    bound = 1.0 / math.sqrt(n_embd)
    keys = jax.random.split(key, 8)
    u = lambda k, shape: jax.random.uniform(k, shape, jnp.float32, -bound, bound)
    return {
        "wq": u(keys[0], (n_embd, n_embd)), "bq": u(keys[1], (n_embd,)),
        "wk": u(keys[2], (n_embd, n_embd)), "bk": u(keys[3], (n_embd,)),
        "wv": u(keys[4], (n_embd, n_embd)), "bv": u(keys[5], (n_embd,)),
        "wp": u(keys[6], (n_embd, n_embd)), "bp": u(keys[7], (n_embd,)),
    }


if __name__ == "__main__":
    # Small config consistent with the module: B=2, T(block_size)=8, n_embd=32, n_head=4.
    B, T, C, n_head = 2, 8, 32, 4

    root = jax.random.PRNGKey(0)
    k_x, k_p = jax.random.split(root)
    x = jax.random.normal(k_x, (B, T, C), dtype=jnp.float32)
    params = init_params(k_p, C)

    out = jax.block_until_ready(self_attention(x, params, n_head))
    ref = reference_self_attention(x, params, n_head)

    assert out.shape == (B, T, C)
    # bf16 MXU operands (f32 accumulation) => compare with a bf16-level tolerance.
    max_err = float(jnp.max(jnp.abs(out - ref)))
    assert jnp.allclose(out, ref, atol=2e-2, rtol=2e-2), f"mismatch vs reference (max abs err {max_err})"

    print("KERNEL_OK")
</pallas_src>

<mosaic_0001>
module attributes {stable_mosaic.version = 11 : i64} {
  func.func @_linear_kernel(%arg0: i32, %arg1: memref<16x32xf32, #tpu.memory_space<vmem>>, %arg2: memref<32x96xbf16, #tpu.memory_space<vmem>>, %arg3: memref<1x96xf32, #tpu.memory_space<vmem>>, %arg4: memref<16x96xbf16, #tpu.memory_space<vmem>>) attributes {dimension_semantics = [#tpu.dimension_semantics<parallel>], iteration_bounds = array<i64: 1>, scalar_prefetch = 0 : i64, scratch_operands = 0 : i64, tpu.core_type = #tpu.core_type<tc>, window_params = [{transform_indices = @transform_0, window_bounds = array<i64: 16, 32>}, {pipeline_mode = #tpu.pipeline_mode<synchronous>, transform_indices = @transform_1, window_bounds = array<i64: 32, 96>}, {pipeline_mode = #tpu.pipeline_mode<synchronous>, transform_indices = @transform_2, window_bounds = array<i64: 1, 96>}, {transform_indices = @transform_3, window_bounds = array<i64: 16, 96>}]} {
    %c0 = arith.constant 0 : index
    %c0_0 = arith.constant 0 : index
    %0 = vector.load %arg1[%c0, %c0_0] : memref<16x32xf32, #tpu.memory_space<vmem>>, vector<16x32xf32>
    %1 = arith.truncf %0 : vector<16x32xf32> to vector<16x32xbf16>
    %c0_1 = arith.constant 0 : index
    %c0_2 = arith.constant 0 : index
    %2 = vector.load %arg2[%c0_1, %c0_2] : memref<32x96xbf16, #tpu.memory_space<vmem>>, vector<32x96xbf16>
    %cst = arith.constant dense<0.000000e+00> : vector<16x96xf32>
    %3 = tpu.matmul %1, %2, %cst {dimension_numbers = #tpu.dot_dimension_numbers<[1], [0], [0], [1], [0, 0, 1, 1], [], []>} : vector<16x32xbf16>, vector<32x96xbf16>, vector<16x96xf32> -> vector<16x96xf32>
    %c0_3 = arith.constant 0 : index
    %c0_4 = arith.constant 0 : index
    %4 = vector.load %arg3[%c0_3, %c0_4] : memref<1x96xf32, #tpu.memory_space<vmem>>, vector<1x96xf32>
    %5 = vector.broadcast %4 : vector<1x96xf32> to vector<16x96xf32>
    %6 = arith.addf %3, %5 : vector<16x96xf32>
    %7 = arith.truncf %6 : vector<16x96xf32> to vector<16x96xbf16>
    %c0_5 = arith.constant 0 : index
    %c0_6 = arith.constant 0 : index
    %8 = vector.load %arg4[%c0_5, %c0_6] : memref<16x96xbf16, #tpu.memory_space<vmem>>, vector<16x96xbf16>
    tpu.vector_store %arg4[%c0_5, %c0_6], %7 {strides = array<i32>} : memref<16x96xbf16, #tpu.memory_space<vmem>>, vector<16x96xbf16>,
    return
  }
  func.func @transform_0(%arg0: i32) -> (i32, i32) {
    %c0_i32 = arith.constant 0 : i32
    %c0_i32_0 = arith.constant 0 : i32
    return %arg0, %c0_i32 : i32, i32
  }
  func.func @transform_1(%arg0: i32) -> (i32, i32) {
    %c0_i32 = arith.constant 0 : i32
    %c0_i32_0 = arith.constant 0 : i32
    %c0_i32_1 = arith.constant 0 : i32
    return %c0_i32, %c0_i32_0 : i32, i32
  }
  func.func @transform_2(%arg0: i32) -> (i32, i32) {
    %c0_i32 = arith.constant 0 : i32
    %c0_i32_0 = arith.constant 0 : i32
    %c0_i32_1 = arith.constant 0 : i32
    return %c0_i32, %c0_i32_0 : i32, i32
  }
  func.func @transform_3(%arg0: i32) -> (i32, i32) {
    %c0_i32 = arith.constant 0 : i32
    %c0_i32_0 = arith.constant 0 : i32
    return %arg0, %c0_i32 : i32, i32
  }
}

</mosaic_0001>

<bundles_post_ra>
// kernel: tpu_custom_call.1
= control target key start
LH: loop header
LB: loop body
LE: loop exit
PB: predicated region body
PF: predicated region fallthrough
CT: control target
= control target key end

     0   :  { %8 = vsyncpa [#allocation3], 0  ;;  %s320_s0 = inlined_call_operand.hbm [shape: f32[16,32], index: 0, kind: input, shape index: {}]   ;;  %s321_s1 = inlined_call_operand.hbm [shape: bf16[32,96], index: 1, kind: input, shape index: {}]   ;;  %s322_s2 = inlined_call_operand.vmem [shape: f32[1,96], index: 2, kind: input, shape index: {}]   ;;  %s323_s3 = inlined_call_operand.hbm [shape: bf16[16,96], index: 3, kind: output, shape index: {}]  }
   0x1   :  { %9 = vsyncpa [#allocation6], 0 }
   0x2   :  { %10 = vsyncpa [#allocation4], 0  ;;  %s246_s12 = smov [#allocation2]   ;;  %s174_s16 = scalar_lea.hbm %s320_s0, 256 }
   0x3   :  { %s16_s13 = sshll.u32 %s246_s12, 4  ;;  %p175_p0 = scmp.ne.s32.totalorder %s320_s0, %s174_s16  ;;  %s17_s13 = int_to_ptr.vmem [resolvable:$true] %s16_s13 }
   0x4   :  { %p178_p1 = scmp.lt.u32.totalorder %s174_s16, %s320_s0 }
   0x6   :  { %p180_p2 = pnand %p178_p1, %p175_p0 }
   0x8   :  { %183 = shalt.err (!%p180_p2)
}
   0x9   :  { %s184_s21 = scalar_lea.vmem %s17_s13, 256  ;;  %p189_p4 = scmp.lt.s32.totalorder %s17_s13, %s17_s13 }
   0xa   :  { %p185_p3 = scmp.ne.s32.totalorder %s17_s13, %s184_s21  ;;  %p190_p5 = scmp.lt.s32.totalorder %s184_s21, %s184_s21 }
   0xc   :  { %p191_p6 = por %p190_p5, %p189_p4 }
   0xe   :  { %p192_p7 = pnand %p191_p6, %p185_p3 }
  0x10   :  { %195 = shalt.err (!%p192_p7)
}
  0x11   :  { %s247_s22 = smov 128   ;;  %s248_s23 = smov 8  }
  0x12   :  { %22 = dma.hbm_to_vmem [thread:$0]  %s320_s0, 256, %s17_s13, [#allocation3], %s247_s22, %s247_s22, %s248_s23  }
  0x13   :  { %s249_s26 = smov [#allocation5]   ;;  %s196_s30 = scalar_lea.hbm %s321_s1, 256 }
  0x14   :  { %s28_s27 = sshll.u32 %s249_s26, 4  ;;  %p197_p8 = scmp.ne.s32.totalorder %s321_s1, %s196_s30  ;;  %s29_s27 = int_to_ptr.vmem [resolvable:$true] %s28_s27 }
  0x15   :  { %p200_p9 = scmp.lt.u32.totalorder %s196_s30, %s321_s1 }
  0x17   :  { %p202_p10 = pnand %p200_p9, %p197_p8 }
  0x19   :  { %205 = shalt.err (!%p202_p10)
}
  0x1a   :  { %s206_s8 = scalar_lea.vmem %s29_s27, 256  ;;  %p211_p12 = scmp.lt.s32.totalorder %s29_s27, %s29_s27 }
  0x1b   :  { %p207_p11 = scmp.ne.s32.totalorder %s29_s27, %s206_s8  ;;  %p212_p13 = scmp.lt.s32.totalorder %s206_s8, %s206_s8 }
  0x1d   :  { %p213_p0 = por %p212_p13, %p211_p12 }
  0x1f   :  { %p214_p1 = pnand %p213_p0, %p207_p11 }
  0x21   :  { %217 = shalt.err (!%p214_p1)
}
  0x22   :  { %s250_s0 = smov 64   ;;  %s251_s9 = smov 4  }
  0x23   :  { %34 = dma.hbm_to_vmem [thread:$0]  %s321_s1, 256, %s29_s27, [#allocation6], %s250_s0, %s250_s0, %s251_s9  }
  0x24   :  { %240 = dma.done.wait [#allocation3], 256  }
  0x25   :  { %241 = vsyncadd [#allocation3], 4294967040 }
  0x26   :  { %242 = dma.done.wait [#allocation6], 256  }
  0x27   :  { %243 = vsyncadd [#allocation6], 4294967040  ;;  %v252_v0 = vmov 0.0   ;;  %vm253_vm0 = vmmov 0   ;;  %v172_v1 = vld [vmem:[#allocation5] sm:$0xff]   ;;  %v173_v2 = vld [vmem:[#allocation5 + $0x8] sm:$0xff]  }
  0x28   :  { %155 = vmatprep.subr.bf16.mxu0 %v252_v0  ;;  %159 = vmatprep.mubr.msk.bf16.mxu0 %vm253_vm0, %v252_v0  ;;  %v44_v3 = vld [vmem:[#allocation2] sm:$0xff]  ;;  %v45_v4 = vld [vmem:[#allocation2 + $0x8] sm:$0xff]  ;;  %vm70_vm1 = vcmask 261120   ;;  %vm123_vm2 = vcmask 781312   ;;  %s254_s13 = smov [#allocation7]  }
  0x29   :  { %156 = vmatpush3.bf16.msra.mxu0 %v172_v1  ;;  %v46_v5 = vpack.c.bf16 %v45_v4, %v44_v3  ;;  %v144_v6 = vld [vmem:[%s322_s2] ss:$0 sm:$0xff]  ;;  %s131_s14 = sshll.u32 %s254_s13, 4  ;;  %s132_s14 = int_to_ptr.vmem [resolvable:$true] %s131_s14 }
  0x2a   :  { %157 = vmatprep.subr.bf16.mxu0 %v252_v0  ;;  %s218_s15 = scalar_lea.vmem %s132_s14, 128  ;;  %p223_p3 = scmp.lt.s32.totalorder %s132_s14, %s132_s14 }
  0x2b   :  { %p219_p2 = scmp.ne.s32.totalorder %s132_s14, %s218_s15  ;;  %p224_p4 = scmp.lt.s32.totalorder %s218_s15, %s218_s15 }
  0x2d   :  { %158 = vmatpush3.bf16.msra.mxu0 %v173_v2  ;;  %p225_p5 = por %p224_p4, %p223_p3 }
  0x2f   :  { %p226_p6 = pnand %p225_p5, %p219_p2 }
  0x30   :  { %160 = vmatmul.mubr.msk.bf16.vlgmr.msra.gmra.mrb[0].mxu0 %vm70_vm1, %v46_v5 }
 0x103   :  { %v108_v7 = vpop.f32.mrb[0].mxu0 }
 0x104   :  { %v109_v8 = vadd.f32 %v144_v6, %v108_v7  ;;  %v161_v9 = vpop.f32.mrb[1].mxu0 }
 0x105   :  { %v111_v10 = vpop.f32.mrb[2].mxu0 }
 0x106   :  { %v150_v11 = vpack.c.bf16 %v109_v8, %v109_v8  ;;  %v112_v12 = vadd.f32 %v144_v6, %v111_v10  ;;  %v162_v13 = vpop.f32.mrb[3].mxu0 }
 0x108   :  { %v151_v14 = vpack.c.bf16 %v112_v12, %v112_v12  ;;  %124 = vst.msk [vmem:[#allocation7] sm:$0xf] %vm123_vm2, %v150_v11 }
 0x10a   :  { %125 = vst.msk [vmem:[#allocation7 + $0x4] sm:$0xf] %vm123_vm2, %v151_v14 }
 0x10b   :  { %229 = shalt.err (!%p226_p6)
}
 0x10c   :  { %s230_s17 = scalar_lea.hbm %s323_s3, 128 }
 0x10d   :  { %p231_p7 = scmp.ne.s32.totalorder %s323_s3, %s230_s17  ;;  %p234_p8 = scmp.lt.u32.totalorder %s230_s17, %s323_s3 }
 0x10f   :  { %p236_p9 = pnand %p234_p8, %p231_p7 }
 0x111   :  { %239 = shalt.err (!%p236_p9)
}
 0x112   :  { %137 = dma.vmem_to_hbm [thread:$0]  %s132_s14, 128, %s323_s3, [#allocation4], %s250_s0, %s250_s0, %s251_s9  }
 0x113   :  { %244 = dma.done.wait [#allocation4], 128  }
 0x114   :  { %245 = vsyncadd [#allocation4], 4294967168 }
 0x115   :  { %141 = vsyncpa [#allocation3], 1 }
 0x116   :  { %142 = vsyncpa [#allocation6], 1 }
 0x117   :  { %143 = vsyncpa [#allocation4], 1 }

</bundles_post_ra>
